<compile_context>
chip_gen: v7x
topology: tpu7x:2x2x1
jax: 0.10.0
libtpu: 0.0.40
codegen_flags: <defaults>
</compile_context>

<pallas_src>
import functools

import numpy as np
import jax
import jax.numpy as jnp
from jax.experimental import pallas as pl
from jax.experimental.pallas import tpu as pltpu

_BN_EPS = 1e-5
_BF16 = jnp.bfloat16
FILTERS = (64, 256, 512, 1024, 2048)       # resnet-152 filters
_VMEM_LIMIT = 32 * 1024 * 1024             # explicit scoped-VMEM ceiling (all gens)
_PATHB_X_BUDGET = 8 * 1024 * 1024          # max resident flat-input bytes for tap kernel


def _round_up(x, m):
    return (x + m - 1) // m * m


def _phys(c):
    """Physical (lane-padded) channel count used for activations / weights."""
    return _round_up(c, 128)


def _pick(size, candidates):
    for c in candidates:
        if size % c == 0:
            return c
    return None


# ---------------------------------------------------------------------------
# Pallas kernel 1: fused GEMM + BN affine + residual(s) + ReLU   (1x1 / im2col)
# ---------------------------------------------------------------------------
def _gemm_kernel(*refs, relu, nk, has_pre, has_post):
    x_ref, w_ref, s_ref, b_ref = refs[:4]
    idx = 4
    rp_ref = None
    rq_ref = None
    if has_pre:
        rp_ref = refs[idx]
        idx += 1
    if has_post:
        rq_ref = refs[idx]
        idx += 1
    o_ref, acc_ref = refs[idx], refs[idx + 1]

    k = pl.program_id(2)

    @pl.when(k == 0)
    def _():
        acc_ref[...] = jnp.zeros_like(acc_ref)

    acc_ref[...] += jnp.dot(x_ref[...], w_ref[...],
                            preferred_element_type=jnp.float32)

    @pl.when(k == nk - 1)
    def _():
        y = acc_ref[...] * s_ref[...] + b_ref[...]
        if has_pre:
            y = y + rp_ref[...].astype(jnp.float32)
        if relu:
            y = jnp.maximum(y, 0.0)
        if has_post:
            y = y + rq_ref[...].astype(jnp.float32)
        o_ref[...] = y.astype(o_ref.dtype)


def _gemm_bn_act(x2d, w2d, scale, shift, res_pre, res_post, relu):
    """out = [relu((x2d @ w2d) * scale + shift + res_pre)] + res_post, bf16."""
    M, K = x2d.shape
    Kw, Np = w2d.shape
    if Kw != K:                                   # only the 7x7 stem needs this
        x2d = jnp.pad(x2d, ((0, 0), (0, Kw - K)))
        K = Kw
    Mp = _round_up(M, 8)
    if Mp != M:                                   # never taken for aligned inputs
        x2d = jnp.pad(x2d, ((0, Mp - M), (0, 0)))
        if res_pre is not None:
            res_pre = jnp.pad(res_pre, ((0, Mp - M), (0, 0)))
        if res_post is not None:
            res_post = jnp.pad(res_post, ((0, Mp - M), (0, 0)))

    tm = _pick(Mp, (512, 256, 128, 64, 32, 16, 8))
    tk = _pick(K, (512, 256, 128))
    tn = _pick(Np, (256, 128))
    grid = (Mp // tm, Np // tn, K // tk)

    has_pre = res_pre is not None
    has_post = res_post is not None

    in_specs = [
        pl.BlockSpec((tm, tk), lambda i, j, k: (i, k)),
        pl.BlockSpec((tk, tn), lambda i, j, k: (k, j)),
        pl.BlockSpec((1, tn), lambda i, j, k: (0, j)),
        pl.BlockSpec((1, tn), lambda i, j, k: (0, j)),
    ]
    args = [x2d, w2d, scale, shift]
    if has_pre:
        in_specs.append(pl.BlockSpec((tm, tn), lambda i, j, k: (i, j)))
        args.append(res_pre)
    if has_post:
        in_specs.append(pl.BlockSpec((tm, tn), lambda i, j, k: (i, j)))
        args.append(res_post)

    bytes_res = (Mp * Np * 2) * (int(has_pre) + int(has_post))
    out = pl.pallas_call(
        functools.partial(_gemm_kernel, relu=relu, nk=grid[2],
                          has_pre=has_pre, has_post=has_post),
        out_shape=jax.ShapeDtypeStruct((Mp, Np), _BF16),
        grid_spec=pltpu.PrefetchScalarGridSpec(
            num_scalar_prefetch=0,
            grid=grid,
            in_specs=in_specs,
            out_specs=pl.BlockSpec((tm, tn), lambda i, j, k: (i, j)),
            scratch_shapes=[pltpu.VMEM((tm, tn), jnp.float32)],
        ),
        compiler_params=pltpu.CompilerParams(
            dimension_semantics=("parallel", "parallel", "arbitrary"),
            vmem_limit_bytes=_VMEM_LIMIT),
        cost_estimate=pl.CostEstimate(
            flops=2 * Mp * Np * K, transcendentals=0,
            bytes_accessed=Mp * K * 2 + K * Np * 2 + Mp * Np * 2 + bytes_res),
    )(*args)
    return out if Mp == M else out[:M]


# ---------------------------------------------------------------------------
# Pallas kernel 2: direct 3x3 / stride-1 conv (taps as K grid axis, no im2col)
# ---------------------------------------------------------------------------
def _conv3x3_kernel(x_ref, w_ref, s_ref, b_ref, h_ref, wi_ref, o_ref, acc_ref,
                    *, H, W, tm, relu):
    i = pl.program_id(0)
    t = pl.program_id(2)          # tap index 0..8  (di*3 + dj)

    @pl.when(t == 0)
    def _():
        acc_ref[...] = jnp.zeros_like(acc_ref)

    di = t // 3
    dj = t % 3
    # flattened (n,h,w) rows; top zero-padding of W+1 rows => offset = di*W + dj
    start = i * tm + di * W + dj
    xb = x_ref[pl.ds(start, tm), :]

    hv = h_ref[...] + di          # (tm, 1) int32
    wv = wi_ref[...] + dj
    ok = (hv >= 1) & (hv <= H) & (wv >= 1) & (wv <= W)
    xb = jnp.where(ok, xb, jnp.zeros_like(xb))

    acc_ref[...] += jnp.dot(xb, w_ref[0],
                            preferred_element_type=jnp.float32)

    @pl.when(t == 8)
    def _():
        y = acc_ref[...] * s_ref[...] + b_ref[...]
        if relu:
            y = jnp.maximum(y, 0.0)
        o_ref[...] = y.astype(o_ref.dtype)


# ---------------------------------------------------------------------------
# im2col glue (used only by the 7x7 stem and 3x3/stride-2 convs)
# ---------------------------------------------------------------------------
def _im2col(x, kh, kw, stride, pad):
    n, h, w, c = x.shape
    xp = jnp.pad(x, ((0, 0), (pad, pad), (pad, pad), (0, 0)))
    hp, wp = h + 2 * pad, w + 2 * pad
    ho = (hp - kh) // stride + 1
    wo = (wp - kw) // stride + 1
    cols = []
    for i in range(kh):
        for j in range(kw):
            cols.append(xp[:, i:i + stride * (ho - 1) + 1:stride,
                            j:j + stride * (wo - 1) + 1:stride, :])
    patches = jnp.concatenate(cols, axis=-1) if len(cols) > 1 else cols[0]
    return patches.reshape(n * ho * wo, kh * kw * c), (n, ho, wo)


# ---------------------------------------------------------------------------
# Conv wrappers
# ---------------------------------------------------------------------------
@functools.partial(jax.jit, static_argnames=("stride", "relu"))
def conv1x1(x, w, scale, shift, res_pre=None, res_post=None, *, stride=1,
            relu=True):
    """1x1 conv + folded BN (+res_pre) (+ReLU) (+res_post).  x NHWC bf16."""
    if stride != 1:
        x = x[:, ::stride, ::stride, :]
    n, h, wd, c = x.shape
    M = n * h * wd
    cout = w.shape[1]
    rp = None if res_pre is None else res_pre.reshape(M, cout)
    rq = None if res_post is None else res_post.reshape(M, cout)
    out = _gemm_bn_act(x.reshape(M, c), w, scale, shift, rp, rq, relu)
    return out.reshape(n, h, wd, cout)


@functools.partial(jax.jit, static_argnames=("kh", "kw", "stride", "relu"))
def conv_im2col(x, w, scale, shift, res_post=None, *, kh, kw, stride, relu=True):
    """General conv via im2col + fused GEMM (stem / stride-2 3x3)."""
    patches, (n, ho, wo) = _im2col(x, kh, kw, stride, (kh - 1) // 2)
    cout = w.shape[1]
    M = n * ho * wo
    rq = None if res_post is None else res_post.reshape(M, cout)
    out = _gemm_bn_act(patches, w, scale, shift, None, rq, relu)
    return out.reshape(n, ho, wo, cout)


@functools.partial(jax.jit, static_argnames=("relu",))
def conv3x3_s1(x, w, scale, shift, *, relu=True):
    """3x3 stride-1 pad-1 conv + folded BN (+ReLU) without materialized im2col.

    x: (N, H, W, C) bf16, w: (9, C, Coutp) bf16.  Falls back to im2col if the
    flattened input would not fit comfortably in VMEM.
    """
    n, h, wd, c = x.shape
    cout = w.shape[2]
    M = n * h * wd
    rows = M + 2 * (wd + 1)
    fits = (rows * c * 2) <= _PATHB_X_BUDGET and (M % 8 == 0)

    if not fits:
        patches, (n2, ho, wo) = _im2col(x, 3, 3, 1, 1)
        out = _gemm_bn_act(patches, w.reshape(9 * c, cout), scale, shift,
                           None, None, relu)
        return out.reshape(n2, ho, wo, cout)

    pad = wd + 1
    xflat = jnp.pad(x.reshape(M, c), ((pad, pad), (0, 0)))
    ridx = jnp.arange(M, dtype=jnp.int32)
    hidx = ((ridx // wd) % h).reshape(M, 1)
    widx = (ridx % wd).reshape(M, 1)

    tm = _pick(M, (512, 256, 128, 64, 32, 16, 8))
    tn = _pick(cout, (256, 128))
    grid = (M // tm, cout // tn, 9)

    out = pl.pallas_call(
        functools.partial(_conv3x3_kernel, H=h, W=wd, tm=tm, relu=relu),
        out_shape=jax.ShapeDtypeStruct((M, cout), _BF16),
        grid_spec=pltpu.PrefetchScalarGridSpec(
            num_scalar_prefetch=0,
            grid=grid,
            in_specs=[
                pl.BlockSpec((rows, c), lambda i, j, t: (0, 0)),   # resident
                pl.BlockSpec((1, c, tn), lambda i, j, t: (t, 0, j)),
                pl.BlockSpec((1, tn), lambda i, j, t: (0, j)),
                pl.BlockSpec((1, tn), lambda i, j, t: (0, j)),
                pl.BlockSpec((tm, 1), lambda i, j, t: (i, 0)),
                pl.BlockSpec((tm, 1), lambda i, j, t: (i, 0)),
            ],
            out_specs=pl.BlockSpec((tm, tn), lambda i, j, t: (i, j)),
            scratch_shapes=[pltpu.VMEM((tm, tn), jnp.float32)],
        ),
        compiler_params=pltpu.CompilerParams(
            dimension_semantics=("parallel", "parallel", "arbitrary"),
            vmem_limit_bytes=_VMEM_LIMIT),
        cost_estimate=pl.CostEstimate(
            flops=2 * M * cout * 9 * c, transcendentals=0,
            bytes_accessed=rows * c * 2 + 9 * c * cout * 2 + M * cout * 2),
    )(xflat, w, scale, shift, hidx, widx)
    return out.reshape(n, h, wd, cout)


# ---------------------------------------------------------------------------
# Plain-JAX glue (pooling / bilinear upsample)
# ---------------------------------------------------------------------------
@jax.jit
def maxpool_3x3_s2(x):
    # nn.MaxPool2d(kernel_size=3, stride=2, padding=1)
    return jax.lax.reduce_window(
        x, jnp.array(-jnp.inf, x.dtype), jax.lax.max,
        window_dimensions=(1, 3, 3, 1), window_strides=(1, 2, 2, 1),
        padding=((0, 0), (1, 1), (1, 1), (0, 0)))


def _resize_matrix(s):
    # x2 bilinear, align_corners=True interpolation matrix, shape (2s, s).
    so = 2 * s
    if s == 1:
        return jnp.ones((so, 1), jnp.float32)
    pos = jnp.arange(so, dtype=jnp.float32) * ((s - 1) / (so - 1))
    i0 = jnp.floor(pos).astype(jnp.int32)
    i1 = jnp.minimum(i0 + 1, s - 1)
    f = pos - i0.astype(jnp.float32)
    return (jax.nn.one_hot(i0, s, dtype=jnp.float32) * (1.0 - f)[:, None]
            + jax.nn.one_hot(i1, s, dtype=jnp.float32) * f[:, None])


@jax.jit
def upsample_bilinear_x2(x):
    # nn.Upsample(scale_factor=2, mode='bilinear', align_corners=True)
    n, h, w, c = x.shape
    mh = _resize_matrix(h)
    mw = _resize_matrix(w)
    xf = x.astype(jnp.float32)
    y = jnp.einsum("oh,nhwc->nowc", mh, xf)
    z = jnp.einsum("pw,nowc->nopc", mw, y)
    return z.astype(x.dtype)


# ---------------------------------------------------------------------------
# Deterministic parameter construction (synthetic weights, no checkpoint)
# ---------------------------------------------------------------------------
def _conv_bn_params(key, kh, kw, in_segs, cout, bias, tap_form):
    """in_segs: list of (logical_channels, physical_channels) per concat segment."""
    cin_l = sum(l for l, _ in in_segs)
    cin_p = sum(p for _, p in in_segs)
    cout_p = _phys(cout)
    k_w, k_g, k_b, k_m, k_bias = jax.random.split(key, 5)
    fan_in = kh * kw * cin_l
    w_l = jax.random.normal(k_w, (kh, kw, cin_l, cout), jnp.float32) / np.sqrt(fan_in)

    # Embed logical weights into the physical (channel-padded) layout; pad
    # rows/cols are zero so padded activation channels stay exactly zero.
    w_p = jnp.zeros((kh, kw, cin_p, cout_p), jnp.float32)
    ol = op = 0
    for l, p in in_segs:
        w_p = w_p.at[:, :, op:op + l, :cout].set(w_l[:, :, ol:ol + l, :])
        ol += l
        op += p

    gamma = 1.0 + 0.05 * jax.random.normal(k_g, (cout,), jnp.float32)
    beta = 0.05 * jax.random.normal(k_b, (cout,), jnp.float32)
    running_mean = 0.02 * jax.random.normal(k_m, (cout,), jnp.float32)
    running_var = jnp.ones((cout,), jnp.float32)
    conv_bias = (0.02 * jax.random.normal(k_bias, (cout,), jnp.float32)
                 if bias else jnp.zeros((cout,), jnp.float32))
    s = gamma / jnp.sqrt(running_var + _BN_EPS)
    sh = beta + (conv_bias - running_mean) * s
    scale = jnp.zeros((1, cout_p), jnp.float32).at[0, :cout].set(s)
    shift = jnp.zeros((1, cout_p), jnp.float32).at[0, :cout].set(sh)

    if tap_form:                       # (9, Cin_p, Cout_p) for the tap kernel
        w = w_p.reshape(kh * kw, cin_p, cout_p).astype(_BF16)
    else:                              # (Kp, Cout_p) for the im2col/1x1 GEMM
        K = kh * kw * cin_p
        Kp = _round_up(K, 128)
        wm = w_p.reshape(K, cout_p)
        if Kp != K:
            wm = jnp.pad(wm, ((0, Kp - K), (0, 0)))
        w = wm.astype(_BF16)
    return {"w": w, "scale": scale, "shift": shift}


def _bottleneck_params(key, in_seg, planes, stride, downsample):
    k1, k2, k3, k4 = jax.random.split(key, 4)
    pp = (planes, _phys(planes))
    p = {
        "conv1": _conv_bn_params(k1, 1, 1, [in_seg], planes, False, tap_form=False),
        "conv2": _conv_bn_params(k2, 3, 3, [pp], planes, False,
                                 tap_form=(stride == 1)),
        "conv3": _conv_bn_params(k3, 1, 1, [pp], 4 * planes, False, tap_form=False),
        "stride": stride,
    }
    if downsample:
        p["down"] = _conv_bn_params(k4, 1, 1, [in_seg], 4 * planes, False,
                                    tap_form=False)
    return p


def _bottleneck_forward(p, x, post_res=None):
    out = conv1x1(x, **p["conv1"], relu=True)
    if p["stride"] == 1:
        out = conv3x3_s1(out, **p["conv2"], relu=True)
    else:
        out = conv_im2col(out, **p["conv2"], kh=3, kw=3, stride=p["stride"],
                          relu=True)
    if "down" in p:
        identity = conv1x1(x, **p["down"], stride=p["stride"], relu=False)
    else:
        identity = x
    # residual add, ReLU and (optional) encoder-stream merge fused in epilogue
    return conv1x1(out, **p["conv3"], relu=True, res_pre=identity,
                   res_post=post_res)


def _res_layer_params(key, in_seg, planes, blocks, stride):
    keys = jax.random.split(key, blocks)
    layer = [_bottleneck_params(keys[0], in_seg, planes, stride, True)]
    seg = (4 * planes, _phys(4 * planes))
    for i in range(1, blocks):
        layer.append(_bottleneck_params(keys[i], seg, planes, 1, False))
    return layer


def _res_layer_forward(layer, x, post_res=None):
    last = len(layer) - 1
    for bi, block in enumerate(layer):
        x = _bottleneck_forward(block, x, post_res if bi == last else None)
    return x


def _encoder_params(key, in_ch):
    # ResNet-152: conv1(7x7/2) + layers [3, 8, 36, 3]
    k0, k1, k2, k3, k4 = jax.random.split(key, 5)
    return {
        "conv1": _conv_bn_params(k0, 7, 7, [(in_ch, in_ch)], 64, False,
                                 tap_form=False),
        "layer1": _res_layer_params(k1, (64, 128), 64, 3, 1),
        "layer2": _res_layer_params(k2, (256, 256), 128, 8, 2),
        "layer3": _res_layer_params(k3, (512, 512), 256, 36, 2),
        "layer4": _res_layer_params(k4, (1024, 1024), 512, 3, 2),
    }


def _cbn_params(key, in_segs, mid_ch, out_ch):       # conv_block_nested
    ka, kb = jax.random.split(key)
    return {"c1": _conv_bn_params(ka, 3, 3, in_segs, mid_ch, True, tap_form=True),
            "c2": _conv_bn_params(kb, 3, 3, [(mid_ch, _phys(mid_ch))], out_ch,
                                  True, tap_form=True)}


def _up_params(key, in_segs, out_ch):                # upsample_layer
    return {"c1": _conv_bn_params(key, 3, 3, in_segs, out_ch, True,
                                  tap_form=True)}


def _cbn_forward(p, x):
    x = conv3x3_s1(x, **p["c1"], relu=True)
    return conv3x3_s1(x, **p["c2"], relu=True)


def _up_forward(p, x):
    return conv3x3_s1(upsample_bilinear_x2(x), **p["c1"], relu=True)


def make_roadseg_params(key, num_labels, use_sne=True):
    keys = jax.random.split(key, 23)
    f = FILTERS
    another_in = 3 if use_sne else 1
    s64 = (64, 128)
    s256 = (256, 256)
    s512 = (512, 512)
    s1024 = (1024, 1024)
    s2048 = (2048, 2048)
    return {
        "enc_rgb": _encoder_params(keys[0], 3),
        "enc_another": _encoder_params(keys[1], another_in),
        "conv1_1": _cbn_params(keys[2], [s64] * 2, f[0], f[0]),
        "conv2_1": _cbn_params(keys[3], [s256] * 2, f[1], f[1]),
        "conv3_1": _cbn_params(keys[4], [s512] * 2, f[2], f[2]),
        "conv4_1": _cbn_params(keys[5], [s1024] * 2, f[3], f[3]),
        "conv1_2": _cbn_params(keys[6], [s64] * 3, f[0], f[0]),
        "conv2_2": _cbn_params(keys[7], [s256] * 3, f[1], f[1]),
        "conv3_2": _cbn_params(keys[8], [s512] * 3, f[2], f[2]),
        "conv1_3": _cbn_params(keys[9], [s64] * 4, f[0], f[0]),
        "conv2_3": _cbn_params(keys[10], [s256] * 4, f[1], f[1]),
        "conv1_4": _cbn_params(keys[11], [s64] * 5, f[0], f[0]),
        "up2_0": _up_params(keys[12], [s256], f[0]),
        "up2_1": _up_params(keys[13], [s256], f[0]),
        "up2_2": _up_params(keys[14], [s256], f[0]),
        "up2_3": _up_params(keys[15], [s256], f[0]),
        "up3_0": _up_params(keys[16], [s512], f[1]),
        "up3_1": _up_params(keys[17], [s512], f[1]),
        "up3_2": _up_params(keys[18], [s512], f[1]),
        "up4_0": _up_params(keys[19], [s1024], f[2]),
        "up4_1": _up_params(keys[20], [s1024], f[2]),
        "up5_0": _up_params(keys[21], [s2048], f[3]),
        "final": _up_params(keys[22], [s64], num_labels),
    }


# ---------------------------------------------------------------------------
# RoadSeg forward
# ---------------------------------------------------------------------------
def roadseg_forward(params, rgb_nchw, another_nchw, num_labels):
    rgb = jnp.transpose(rgb_nchw, (0, 2, 3, 1)).astype(_BF16)
    another = jnp.transpose(another_nchw, (0, 2, 3, 1)).astype(_BF16)
    er, ea = params["enc_rgb"], params["enc_another"]

    # stems; the rgb+another merge is fused into the rgb stem's epilogue
    another_stem = conv_im2col(another, **ea["conv1"], kh=7, kw=7, stride=2,
                               relu=True)
    x1_0 = conv_im2col(rgb, **er["conv1"], kh=7, kw=7, stride=2, relu=True,
                       res_post=another_stem)
    rgb = maxpool_3x3_s2(x1_0)
    another = maxpool_3x3_s2(another_stem)

    # encoder stages; stream merge fused into the last bottleneck of each stage
    another = _res_layer_forward(ea["layer1"], another)
    x2_0 = _res_layer_forward(er["layer1"], rgb, post_res=another)
    another = _res_layer_forward(ea["layer2"], another)
    x3_0 = _res_layer_forward(er["layer2"], x2_0, post_res=another)
    another = _res_layer_forward(ea["layer3"], another)
    x4_0 = _res_layer_forward(er["layer3"], x3_0, post_res=another)
    another = _res_layer_forward(ea["layer4"], another)
    x5_0 = _res_layer_forward(er["layer4"], x4_0, post_res=another)

    cat = lambda *xs: jnp.concatenate(xs, axis=-1)   # NHWC channel concat
    x1_1 = _cbn_forward(params["conv1_1"], cat(x1_0, _up_forward(params["up2_0"], x2_0)))
    x2_1 = _cbn_forward(params["conv2_1"], cat(x2_0, _up_forward(params["up3_0"], x3_0)))
    x3_1 = _cbn_forward(params["conv3_1"], cat(x3_0, _up_forward(params["up4_0"], x4_0)))
    x4_1 = _cbn_forward(params["conv4_1"], cat(x4_0, _up_forward(params["up5_0"], x5_0)))
    x1_2 = _cbn_forward(params["conv1_2"], cat(x1_0, x1_1, _up_forward(params["up2_1"], x2_1)))
    x2_2 = _cbn_forward(params["conv2_2"], cat(x2_0, x2_1, _up_forward(params["up3_1"], x3_1)))
    x3_2 = _cbn_forward(params["conv3_2"], cat(x3_0, x3_1, _up_forward(params["up4_1"], x4_1)))
    x1_3 = _cbn_forward(params["conv1_3"], cat(x1_0, x1_1, x1_2, _up_forward(params["up2_2"], x2_2)))
    x2_3 = _cbn_forward(params["conv2_3"], cat(x2_0, x2_1, x2_2, _up_forward(params["up3_2"], x3_2)))
    x1_4 = _cbn_forward(params["conv1_4"], cat(x1_0, x1_1, x1_2, x1_3, _up_forward(params["up2_3"], x2_3)))
    out = _up_forward(params["final"], x1_4)

    out = out[..., :num_labels]                      # drop physical channel pad
    return jnp.transpose(out, (0, 3, 1, 2)).astype(jnp.float32)   # back to NCHW


if __name__ == "__main__":
    key = jax.random.PRNGKey(0)
    kp, kr, ka = jax.random.split(key, 3)
    num_labels = 2
    params = make_roadseg_params(kp, num_labels, use_sne=True)

    N, H, W = 2, 64, 64                              # H, W multiples of 32
    rgb = jax.random.normal(kr, (N, 3, H, W), jnp.float32)
    another = jax.random.normal(ka, (N, 3, H, W), jnp.float32)

    out = roadseg_forward(params, rgb, another, num_labels)
    out = jax.block_until_ready(out)
    assert out.shape == (N, num_labels, H, W), out.shape
    print("KERNEL_OK")
</pallas_src>

<mosaic_0001>
module attributes {stable_mosaic.version = 11 : i64} {
  func.func @_gemm_kernel(%arg0: i32, %arg1: i32, %arg2: i32, %arg3: memref<512x256xbf16, #tpu.memory_space<vmem>>, %arg4: memref<256x128xbf16, #tpu.memory_space<vmem>>, %arg5: memref<1x128xf32, #tpu.memory_space<vmem>>, %arg6: memref<1x128xf32, #tpu.memory_space<vmem>>, %arg7: memref<512x128xbf16, #tpu.memory_space<vmem>>, %arg8: memref<512x128xf32, #tpu.memory_space<vmem>>) attributes {dimension_semantics = [#tpu.dimension_semantics<parallel>, #tpu.dimension_semantics<parallel>, #tpu.dimension_semantics<arbitrary>], iteration_bounds = array<i64: 4, 1, 1>, scalar_prefetch = 0 : i64, scratch_operands = 1 : i64, tpu.core_type = #tpu.core_type<tc>, window_params = [{transform_indices = @transform_0, window_bounds = array<i64: 512, 256>}, {transform_indices = @transform_1, window_bounds = array<i64: 256, 128>}, {transform_indices = @transform_2, window_bounds = array<i64: 1, 128>}, {transform_indices = @transform_3, window_bounds = array<i64: 1, 128>}, {transform_indices = @transform_4, window_bounds = array<i64: 512, 128>}]} {
    %c0_i32 = arith.constant 0 : i32
    %0 = arith.cmpi eq, %arg2, %c0_i32 : i32
    %1 = arith.extui %0 : i1 to i32
    %c0_i32_0 = arith.constant 0 : i32
    %2 = arith.cmpi ne, %1, %c0_i32_0 : i32
    scf.if %2 {
      %cst_10 = arith.constant 0.000000e+00 : f32
      %12 = vector.broadcast %cst_10 : f32 to vector<512x128xf32>
      %c0_11 = arith.constant 0 : index
      %c0_12 = arith.constant 0 : index
      %13 = vector.load %arg8[%c0_11, %c0_12] : memref<512x128xf32, #tpu.memory_space<vmem>>, vector<512x128xf32>
      tpu.vector_store %arg8[%c0_11, %c0_12], %12 {strides = array<i32>} : memref<512x128xf32, #tpu.memory_space<vmem>>, vector<512x128xf32>,
    } else {
    }
    %c0 = arith.constant 0 : index
    %c0_1 = arith.constant 0 : index
    %3 = vector.load %arg8[%c0, %c0_1] : memref<512x128xf32, #tpu.memory_space<vmem>>, vector<512x128xf32>
    %c0_2 = arith.constant 0 : index
    %c0_3 = arith.constant 0 : index
    %4 = vector.load %arg3[%c0_2, %c0_3] : memref<512x256xbf16, #tpu.memory_space<vmem>>, vector<512x256xbf16>
    %c0_4 = arith.constant 0 : index
    %c0_5 = arith.constant 0 : index
    %5 = vector.load %arg4[%c0_4, %c0_5] : memref<256x128xbf16, #tpu.memory_space<vmem>>, vector<256x128xbf16>
    %cst = arith.constant dense<0.000000e+00> : vector<512x128xf32>
    %6 = tpu.matmul %4, %5, %cst {dimension_numbers = #tpu.dot_dimension_numbers<[1], [0], [0], [1], [0, 0, 1, 1], [], []>} : vector<512x256xbf16>, vector<256x128xbf16>, vector<512x128xf32> -> vector<512x128xf32>
    %7 = arith.addf %3, %6 : vector<512x128xf32>
    %c0_6 = arith.constant 0 : index
    %c0_7 = arith.constant 0 : index
    %8 = vector.load %arg8[%c0_6, %c0_7] : memref<512x128xf32, #tpu.memory_space<vmem>>, vector<512x128xf32>
    tpu.vector_store %arg8[%c0_6, %c0_7], %7 {strides = array<i32>} : memref<512x128xf32, #tpu.memory_space<vmem>>, vector<512x128xf32>,
    %c0_i32_8 = arith.constant 0 : i32
    %9 = arith.cmpi eq, %arg2, %c0_i32_8 : i32
    %10 = arith.extui %9 : i1 to i32
    %c0_i32_9 = arith.constant 0 : i32
    %11 = arith.cmpi ne, %10, %c0_i32_9 : i32
    scf.if %11 {
      %c0_10 = arith.constant 0 : index
      %c0_11 = arith.constant 0 : index
      %12 = vector.load %arg8[%c0_10, %c0_11] : memref<512x128xf32, #tpu.memory_space<vmem>>, vector<512x128xf32>
      %c0_12 = arith.constant 0 : index
      %c0_13 = arith.constant 0 : index
      %13 = vector.load %arg5[%c0_12, %c0_13] : memref<1x128xf32, #tpu.memory_space<vmem>>, vector<1x128xf32>
      %14 = vector.broadcast %13 : vector<1x128xf32> to vector<512x128xf32>
      %15 = arith.mulf %12, %14 : vector<512x128xf32>
      %c0_14 = arith.constant 0 : index
      %c0_15 = arith.constant 0 : index
      %16 = vector.load %arg6[%c0_14, %c0_15] : memref<1x128xf32, #tpu.memory_space<vmem>>, vector<1x128xf32>
      %17 = vector.broadcast %16 : vector<1x128xf32> to vector<512x128xf32>
      %18 = arith.addf %15, %17 : vector<512x128xf32>
      %cst_16 = arith.constant 0.000000e+00 : f32
      %19 = vector.broadcast %cst_16 : f32 to vector<512x128xf32>
      %20 = arith.maximumf %18, %19 : vector<512x128xf32>
      %21 = arith.truncf %20 : vector<512x128xf32> to vector<512x128xbf16>
      %c0_17 = arith.constant 0 : index
      %c0_18 = arith.constant 0 : index
      %22 = vector.load %arg7[%c0_17, %c0_18] : memref<512x128xbf16, #tpu.memory_space<vmem>>, vector<512x128xbf16>
      tpu.vector_store %arg7[%c0_17, %c0_18], %21 {strides = array<i32>} : memref<512x128xbf16, #tpu.memory_space<vmem>>, vector<512x128xbf16>,
    } else {
    }
    return
  }
  func.func @transform_0(%arg0: i32, %arg1: i32, %arg2: i32) -> (i32, i32) {
    %c0_i32 = arith.constant 0 : i32
    return %arg0, %arg2 : i32, i32
  }
  func.func @transform_1(%arg0: i32, %arg1: i32, %arg2: i32) -> (i32, i32) {
    %c0_i32 = arith.constant 0 : i32
    return %arg2, %arg1 : i32, i32
  }
  func.func @transform_2(%arg0: i32, %arg1: i32, %arg2: i32) -> (i32, i32) {
    %c0_i32 = arith.constant 0 : i32
    %c0_i32_0 = arith.constant 0 : i32
    return %c0_i32, %arg1 : i32, i32
  }
  func.func @transform_3(%arg0: i32, %arg1: i32, %arg2: i32) -> (i32, i32) {
    %c0_i32 = arith.constant 0 : i32
    %c0_i32_0 = arith.constant 0 : i32
    return %c0_i32, %arg1 : i32, i32
  }
  func.func @transform_4(%arg0: i32, %arg1: i32, %arg2: i32) -> (i32, i32) {
    %c0_i32 = arith.constant 0 : i32
    return %arg0, %arg1 : i32, i32
  }
}

</mosaic_0001>

<bundles_post_ra>
// kernel: conv_im2col.1
= control target key start
LH: loop header
LB: loop body
LE: loop exit
PB: predicated region body
PF: predicated region fallthrough
CT: control target
= control target key end

     0   :  { %9 = vsyncpa [#allocation4], 0  ;;  %s3261_s0 = inlined_call_operand.vmem [shape: bf16[2048,256], index: 0, kind: input, shape index: {}]   ;;  %s3262_s1 = inlined_call_operand.vmem [shape: bf16[256,128], index: 1, kind: input, shape index: {}]   ;;  %s3263_s2 = inlined_call_operand.vmem [shape: f32[1,128], index: 2, kind: input, shape index: {}]   ;;  %s3264_s3 = inlined_call_operand.vmem [shape: f32[1,128], index: 3, kind: input, shape index: {}]   ;;  %s3265_s4 = inlined_call_operand.hbm [shape: bf16[2048,128], index: 4, kind: output, shape index: {}]  }
   0x1   :  { %11 = vsyncpa [#allocation4 + $0x1], 0  ;;  %s2824_s15 = smov 0   ;;  %s2826_s16 = smov 0  }
   0x2   :  { %s2828_s17 = smov 0   ;;  %s2830_s18 = smov 0  }
   0x3   :  { %s2832_s19 = smov 0   ;;  %s2834_s20 = smov 0  }
   0x4 LB: > { %s2093_s21 = sadd.s32 4294967295, %s2793_s20   ;;  %s2094_s22 = sadd.s32 4294967294, %s2793_s20   ;;  %s2793_s20 = sphi %s2834_s20, %s17_s20   ;;  %s2789_s19 = sphi %s2832_s19, %s3272_s19   ;;  %s2785_s18 = sphi %s2830_s18, %s3271_s18   ;;  %s2781_s17 = sphi %s2828_s17, %s3270_s17   ;;  %s2777_s16 = sphi %s2826_s16, %s3269_s16   ;;  %s2773_s15 = sphi %s2824_s15, %s3268_s15  }
   0x5   : > { %s36_s23 = sadd.s32 1, %s2789_s19  ;;  %s153_s24 = sadd.s32 1, %s2781_s17 }
   0x6   : > { %p38_p0 = scmp.ge.s32.totalorder %s36_s23, 4  ;;  %p163_p1 = scmp.ne.s32.totalorder %s2781_s17, %s2777_s16 }
   0x7   : > { %p164_p2 = scmp.eq.s32.totalorder %s2093_s21, 3  ;;  %p169_p3 = scmp.ne.s32.totalorder %s2777_s16, %s2773_s15 }
   0x8   : > { %s3274_s23 = smov (%p38_p0, %s36_s23), 0  ;;  %p170_p5 = scmp.eq.s32.totalorder %s2094_s22, 3 }
   0x9   : > { %p2864_p4 = por %p164_p2, %p163_p1  ;;  %s148_s26 = ssub.s32 %s2789_s19, %s3274_s23 }
   0xa   : > { %p2100_p6 = scmp.ge.s32.totalorder %s2793_s20, 1  ;;  %p151_p7 = scmp.eq.s32.totalorder %s148_s26, 0 }
   0xb   : > { %p2871_p8 = por %p170_p5, %p169_p3  ;;  %p227_p9 = scmp.lt.s32.totalorder %s2793_s20, 5 }
   0xc   : > { %s2877_s28 = scalar_select %p151_p7, %s2781_s17, %s153_s24  }
   0xd   : > { %p228_p10 = pnand %p2100_p6, %p227_p9 }
   0xe   : > { %v2603_v0 = vld [vmem:[%s3262_s1] sm:$0xff] (!%p228_p10)   ;;  %v2795_v1 = vmov (!%p228_p10), 0   ;;  %s2102_s5 = sshll.u32 (!%p228_p10), %s2785_s18, 6  ;;  %v2604_v2 = vld [vmem:[%s3262_s1 + $0x8] sm:$0xff] (!%p228_p10)   ;;  %v2605_v3 = vld [vmem:[%s3262_s1 + $0x10] sm:$0xff] (!%p228_p10)   ;;  %s2321_s21 = sshll.u32 (!%p228_p10), %s2785_s18, 12 }
   0xf   : > { %231 = sbr.rel (%p228_p10) target bundleno = 437 (0x1b5), region = 36  ;;  %945 = vmatprep.subr.bf16.mxu0 (!%p228_p10), %v2795_v1  ;;  %2513 = vmatprep.subr.bf16.mxu1 (!%p228_p10), %v2795_v1  ;;  %p274_p11 = scmp.lt.s32.totalorder (!%p228_p10), %s2102_s5, 255  ;;  %v2606_v4 = vld [vmem:[%s3262_s1 + $0x18] sm:$0xff] (!%p228_p10)   ;;  %v2607_v5 = vld [vmem:[%s3262_s1 + $0x20] sm:$0xff] (!%p228_p10)   ;;  %v2608_v7 = vld [vmem:[%s3262_s1 + $0x28] sm:$0xff] (!%p228_p10)  }
  0x10   : > { %946 = vmatpush1.bf16.msra.mxu0 (!%p228_p10), %v2603_v0  ;;  %2529 = vmatpush1.bf16.msra.mxu1 (!%p228_p10), %v2603_v0  ;;  %v2609_v9 = vld [vmem:[%s3262_s1 + $0x30] sm:$0xff] (!%p228_p10)   ;;  %v2610_v10 = vld [vmem:[%s3262_s1 + $0x38] sm:$0xff] (!%p228_p10)   ;;  %v2611_v11 = vld [vmem:[%s3262_s1 + $0x40] sm:$0xff] (!%p228_p10)   ;;  %s3207_s30 = scalar_lea.hbm (!%p228_p10), %s3265_s4, %s2321_s21  ;;  %s2796_s6 = smov (!%p228_p10), [#allocation3]  }
  0x11   : > { %947 = vmatprep.subr.bf16.mxu0 (!%p228_p10), %v2795_v1  ;;  %2514 = vmatprep.subr.bf16.mxu1 (!%p228_p10), %v2795_v1  ;;  %v2612_v12 = vld [vmem:[%s3262_s1 + $0x48] sm:$0xff] (!%p228_p10)   ;;  %v2613_v13 = vld [vmem:[%s3262_s1 + $0x50] sm:$0xff] (!%p228_p10)   ;;  %v2614_v14 = vld [vmem:[%s3262_s1 + $0x58] sm:$0xff] (!%p228_p10)   ;;  %s2719_s7 = sshll.u32 (!%p228_p10), %s2796_s6, 4  ;;  %s2720_s7 = int_to_ptr.vmem [resolvable:$false] %s2719_s7 }
  0x12   : > { %v2615_v15 = vld [vmem:[%s3262_s1 + $0x60] sm:$0xff] (!%p228_p10)   ;;  %v2616_v16 = vld [vmem:[%s3262_s1 + $0x68] sm:$0xff] (!%p228_p10)   ;;  %v2617_v17 = vld [vmem:[%s3262_s1 + $0x70] sm:$0xff] (!%p228_p10)   ;;  %s2721_s8 = scalar_lea.vmem (!%p228_p10), %s2720_s7, 8192 }
  0x13   : > { %v2618_v18 = vld [vmem:[%s3262_s1 + $0x78] sm:$0xff] (!%p228_p10)  }
  0x14   : > { %948 = vmatpush1.bf16.msra.mxu0 (!%p228_p10), %v2604_v2  ;;  %2530 = vmatpush1.bf16.msra.mxu1 (!%p228_p10), %v2604_v2 }
  0x15   : > { %949 = vmatprep.subr.bf16.mxu0 (!%p228_p10), %v2795_v1  ;;  %2515 = vmatprep.subr.bf16.mxu1 (!%p228_p10), %v2795_v1 }
  0x16   : > { %s3276_s5 = smov (!%p274_p11, %s2102_s5), 255 }
  0x17   : > { %s2256_s12 = sshll.u32 %s3276_s5, 3 }
  0x18   : > { %950 = vmatpush1.bf16.msra.mxu0 %v2605_v3  ;;  %2531 = vmatpush1.bf16.msra.mxu1 %v2605_v3  ;;  %s2906_s24 = scalar_lea.vmem %s3261_s0, %s2256_s12 }
  0x19   : > { %951 = vmatprep.subr.bf16.mxu0 %v2795_v1  ;;  %2516 = vmatprep.subr.bf16.mxu1 %v2795_v1  ;;  %v2621_v6 = vld [vmem:[%s2906_s24 + $0x4] ss:$8 sps:$4 sm:$0xff]   ;;  %v2619_v19 = vld [vmem:[%s2906_s24] ss:$8 sps:$4 sm:$0xff]   ;;  %v2625_v21 = vld [vmem:[%s2906_s24 + $0x14] ss:$8 sps:$4 sm:$0xff]  }
  0x1a   : > { %v2624_v8 = vld [vmem:[%s2906_s24 + $0x104] ss:$8 sps:$4 sm:$0xff]   ;;  %977 = vmatprep.mubr.bf16.mxu0 %v2621_v6  ;;  %v2622_v20 = vld [vmem:[%s2906_s24 + $0x100] ss:$8 sps:$4 sm:$0xff]   ;;  %v2627_v22 = vld [vmem:[%s2906_s24 + $0x114] ss:$8 sps:$4 sm:$0xff]  }
  0x1b   : > { %1105 = vmatprep.mubr.bf16.mxu1 %v2624_v8  ;;  %v2629_v23 = vld [vmem:[%s2906_s24 + $0x10] ss:$8 sps:$4 sm:$0xff]   ;;  %v2631_v25 = vld [vmem:[%s2906_s24 + $0x24] ss:$8 sps:$4 sm:$0xff]   ;;  %v2635_v27 = vld [vmem:[%s2906_s24 + $0x20] ss:$8 sps:$4 sm:$0xff]  }
  0x1c   : > { %952 = vmatpush1.bf16.msra.mxu0 %v2606_v4  ;;  %2532 = vmatpush1.bf16.msra.mxu1 %v2606_v4  ;;  %v2630_v24 = vld [vmem:[%s2906_s24 + $0x110] ss:$8 sps:$4 sm:$0xff]   ;;  %v2633_v26 = vld [vmem:[%s2906_s24 + $0x124] ss:$8 sps:$4 sm:$0xff]   ;;  %v2636_v28 = vld [vmem:[%s2906_s24 + $0x120] ss:$8 sps:$4 sm:$0xff]  }
  0x1d   : > { %953 = vmatprep.subr.bf16.mxu0 %v2795_v1  ;;  %2517 = vmatprep.subr.bf16.mxu1 %v2795_v1  ;;  %v2637_v29 = vld [vmem:[%s2906_s24 + $0x34] ss:$8 sps:$4 sm:$0xff]   ;;  %v2641_v31 = vld [vmem:[%s2906_s24 + $0x30] ss:$8 sps:$4 sm:$0xff]   ;;  %v2643_v33 = vld [vmem:[%s2906_s24 + $0x44] ss:$8 sps:$4 sm:$0xff]  }
  0x1e   : > { %v2639_v30 = vld [vmem:[%s2906_s24 + $0x134] ss:$8 sps:$4 sm:$0xff]   ;;  %v2642_v32 = vld [vmem:[%s2906_s24 + $0x130] ss:$8 sps:$4 sm:$0xff]   ;;  %v2645_v34 = vld [vmem:[%s2906_s24 + $0x144] ss:$8 sps:$4 sm:$0xff]  }
  0x1f   : > { %v2647_v35 = vld [vmem:[%s2906_s24 + $0x40] ss:$8 sps:$4 sm:$0xff]   ;;  %v2649_v37 = vld [vmem:[%s2906_s24 + $0x54] ss:$8 sps:$4 sm:$0xff]   ;;  %v2653_v39 = vld [vmem:[%s2906_s24 + $0x50] ss:$8 sps:$4 sm:$0xff]  }
  0x20   : > { %954 = vmatpush1.bf16.msra.mxu0 %v2607_v5  ;;  %2533 = vmatpush1.bf16.msra.mxu1 %v2607_v5  ;;  %v2648_v36 = vld [vmem:[%s2906_s24 + $0x140] ss:$8 sps:$4 sm:$0xff]   ;;  %v2651_v38 = vld [vmem:[%s2906_s24 + $0x154] ss:$8 sps:$4 sm:$0xff]   ;;  %v2654_v40 = vld [vmem:[%s2906_s24 + $0x150] ss:$8 sps:$4 sm:$0xff]  }
  0x21   : > { %955 = vmatprep.subr.bf16.mxu0 %v2795_v1  ;;  %2518 = vmatprep.subr.bf16.mxu1 %v2795_v1  ;;  %v2655_v41 = vld [vmem:[%s2906_s24 + $0x64] ss:$8 sps:$4 sm:$0xff]   ;;  %v2659_v43 = vld [vmem:[%s2906_s24 + $0x60] ss:$8 sps:$4 sm:$0xff]   ;;  %v2661_v45 = vld [vmem:[%s2906_s24 + $0x74] ss:$8 sps:$4 sm:$0xff]  }
  0x22   : > { %v2657_v42 = vld [vmem:[%s2906_s24 + $0x164] ss:$8 sps:$4 sm:$0xff]   ;;  %v2660_v44 = vld [vmem:[%s2906_s24 + $0x160] ss:$8 sps:$4 sm:$0xff]   ;;  %v2663_v46 = vld [vmem:[%s2906_s24 + $0x174] ss:$8 sps:$4 sm:$0xff]  }
  0x23   : > { %v2665_v47 = vld [vmem:[%s2906_s24 + $0x70] ss:$8 sps:$4 sm:$0xff]   ;;  %v2667_v49 = vld [vmem:[%s2906_s24 + $0x84] ss:$8 sps:$4 sm:$0xff]   ;;  %v2671_v51 = vld [vmem:[%s2906_s24 + $0x80] ss:$8 sps:$4 sm:$0xff]  }
  0x24   : > { %956 = vmatpush1.bf16.msra.mxu0 %v2608_v7  ;;  %2534 = vmatpush1.bf16.msra.mxu1 %v2608_v7  ;;  %v2666_v48 = vld [vmem:[%s2906_s24 + $0x170] ss:$8 sps:$4 sm:$0xff]   ;;  %v2669_v50 = vld [vmem:[%s2906_s24 + $0x184] ss:$8 sps:$4 sm:$0xff]   ;;  %v2672_v52 = vld [vmem:[%s2906_s24 + $0x180] ss:$8 sps:$4 sm:$0xff]  }
  0x25   : > { %957 = vmatprep.subr.bf16.mxu0 %v2795_v1  ;;  %2519 = vmatprep.subr.bf16.mxu1 %v2795_v1  ;;  %v2673_v53 = vld [vmem:[%s2906_s24 + $0x94] ss:$8 sps:$4 sm:$0xff]   ;;  %v2677_v55 = vld [vmem:[%s2906_s24 + $0x90] ss:$8 sps:$4 sm:$0xff]   ;;  %v2679_v57 = vld [vmem:[%s2906_s24 + $0xa4] ss:$8 sps:$4 sm:$0xff]  }
  0x26   : > { %v2675_v54 = vld [vmem:[%s2906_s24 + $0x194] ss:$8 sps:$4 sm:$0xff]   ;;  %v2678_v56 = vld [vmem:[%s2906_s24 + $0x190] ss:$8 sps:$4 sm:$0xff]   ;;  %v2681_v58 = vld [vmem:[%s2906_s24 + $0x1a4] ss:$8 sps:$4 sm:$0xff]  }
  0x27   : > { %v2683_v59 = vld [vmem:[%s2906_s24 + $0xa0] ss:$8 sps:$4 sm:$0xff]   ;;  %v2685_v61 = vld [vmem:[%s2906_s24 + $0xb4] ss:$8 sps:$4 sm:$0xff]   ;;  %v2689_v63 = vld [vmem:[%s2906_s24 + $0xb0] ss:$8 sps:$4 sm:$0xff]  }
  0x28   : > { %958 = vmatpush1.bf16.msra.mxu0 %v2609_v9  ;;  %2535 = vmatpush1.bf16.msra.mxu1 %v2609_v9  ;;  %v2684_v60 = vld [vmem:[%s2906_s24 + $0x1a0] ss:$8 sps:$4 sm:$0xff]   ;;  %v2687_v62 = vld [vmem:[%s2906_s24 + $0x1b4] ss:$8 sps:$4 sm:$0xff]   ;;  %v2690_v0 = vld [vmem:[%s2906_s24 + $0x1b0] ss:$8 sps:$4 sm:$0xff]  }
  0x29   : > { %959 = vmatprep.subr.bf16.mxu0 %v2795_v1  ;;  %2520 = vmatprep.subr.bf16.mxu1 %v2795_v1  ;;  %v2693_v2 = vld [vmem:[%s2906_s24 + $0x1c4] ss:$8 sps:$4 sm:$0xff]   ;;  %v2695_v3 = vld [vmem:[%s2906_s24 + $0xc0] ss:$8 sps:$4 sm:$0xff]   ;;  %v2697_v5 = vld [vmem:[%s2906_s24 + $0xd4] ss:$8 sps:$4 sm:$0xff]  }
  0x2a   : > { %v2696_v4 = vld [vmem:[%s2906_s24 + $0x1c0] ss:$8 sps:$4 sm:$0xff]   ;;  %v2699_v6 = vld [vmem:[%s2906_s24 + $0x1d4] ss:$8 sps:$4 sm:$0xff]   ;;  %v2701_v7 = vld [vmem:[%s2906_s24 + $0xd0] ss:$8 sps:$4 sm:$0xff]  }
  0x2b   : > { %v2702_v8 = vld [vmem:[%s2906_s24 + $0x1d0] ss:$8 sps:$4 sm:$0xff]   ;;  %v2703_v9 = vld [vmem:[%s2906_s24 + $0xe4] ss:$8 sps:$4 sm:$0xff]  }
  0x2c   : > { %960 = vmatpush1.bf16.msra.mxu0 %v2610_v10  ;;  %2536 = vmatpush1.bf16.msra.mxu1 %v2610_v10  ;;  %v2705_v10 = vld [vmem:[%s2906_s24 + $0x1e4] ss:$8 sps:$4 sm:$0xff]  }
  0x2d   : > { %961 = vmatprep.subr.bf16.mxu0 %v2795_v1  ;;  %2521 = vmatprep.subr.bf16.mxu1 %v2795_v1 }
  0x30   : > { %962 = vmatpush1.bf16.msra.mxu0 %v2611_v11  ;;  %2537 = vmatpush1.bf16.msra.mxu1 %v2611_v11  ;;  %v2707_v11 = vld [vmem:[%s2906_s24 + $0xe0] ss:$8 sps:$4 sm:$0xff]  }
  0x31   : > { %963 = vmatprep.subr.bf16.mxu0 %v2795_v1  ;;  %2522 = vmatprep.subr.bf16.mxu1 %v2795_v1 }
  0x34   : > { %964 = vmatpush1.bf16.msra.mxu0 %v2612_v12  ;;  %2538 = vmatpush1.bf16.msra.mxu1 %v2612_v12  ;;  %v2708_v12 = vld [vmem:[%s2906_s24 + $0x1e0] ss:$8 sps:$4 sm:$0xff]  }
  0x35   : > { %965 = vmatprep.subr.bf16.mxu0 %v2795_v1  ;;  %2523 = vmatprep.subr.bf16.mxu1 %v2795_v1 }
  0x38   : > { %966 = vmatpush1.bf16.msra.mxu0 %v2613_v13  ;;  %2539 = vmatpush1.bf16.msra.mxu1 %v2613_v13  ;;  %v2709_v13 = vld [vmem:[%s2906_s24 + $0xf4] ss:$8 sps:$4 sm:$0xff]  }
  0x39   : > { %967 = vmatprep.subr.bf16.mxu0 %v2795_v1  ;;  %2524 = vmatprep.subr.bf16.mxu1 %v2795_v1 }
  0x3c   : > { %968 = vmatpush1.bf16.msra.mxu0 %v2614_v14  ;;  %2540 = vmatpush1.bf16.msra.mxu1 %v2614_v14  ;;  %v2711_v14 = vld [vmem:[%s2906_s24 + $0x1f4] ss:$8 sps:$4 sm:$0xff]  }
  0x3d   : > { %969 = vmatprep.subr.bf16.mxu0 %v2795_v1  ;;  %2525 = vmatprep.subr.bf16.mxu1 %v2795_v1 }
  0x40   : > { %970 = vmatpush1.bf16.msra.mxu0 %v2615_v15  ;;  %2541 = vmatpush1.bf16.msra.mxu1 %v2615_v15  ;;  %v2713_v15 = vld [vmem:[%s2906_s24 + $0xf0] ss:$8 sps:$4 sm:$0xff]  }
  0x41   : > { %971 = vmatprep.subr.bf16.mxu0 %v2795_v1  ;;  %2526 = vmatprep.subr.bf16.mxu1 %v2795_v1 }
  0x44   : > { %972 = vmatpush1.bf16.msra.mxu0 %v2616_v16  ;;  %2542 = vmatpush1.bf16.msra.mxu1 %v2616_v16  ;;  %v2714_v16 = vld [vmem:[%s2906_s24 + $0x1f0] ss:$8 sps:$4 sm:$0xff]  }
  0x45   : > { %973 = vmatprep.subr.bf16.mxu0 %v2795_v1  ;;  %2527 = vmatprep.subr.bf16.mxu1 %v2795_v1 }
  0x48   : > { %974 = vmatpush1.bf16.msra.mxu0 %v2617_v17  ;;  %2543 = vmatpush1.bf16.msra.mxu1 %v2617_v17  ;;  %v3032_v17 = vld [vmem:[%s3263_s2] ss:$0 sm:$0xff] }
  0x49   : > { %975 = vmatprep.subr.bf16.mxu0 %v2795_v1  ;;  %2528 = vmatprep.subr.bf16.mxu1 %v2795_v1  ;;  %v2691_v1 = vld [vmem:[%s2906_s24 + $0xc4] ss:$8 sps:$4 sm:$0xff]   ;;  %s269_s24 = sand.u32 1, %s2777_s16  }
  0x4a   : > { %s2101_s13 = sshll.u32 %s269_s24, 8  ;;  %s3215_s18 = scalar_lea.sflag [#allocation4], %s269_s24 }
  0x4b   : > { %s3052_s14 = scalar_lea.vmem [#allocation3], %s2101_s13 }
  0x4c   : > { %976 = vmatpush1.bf16.msra.mxu0 %v2618_v18  ;;  %2544 = vmatpush1.bf16.msra.mxu1 %v2618_v18  ;;  %s1970_s22 = sshll.u32 %s3052_s14, 4  ;;  %s3209_s22 = int_to_ptr.vmem [resolvable:$true] %s1970_s22 }
  0x4d   : > { %s2715_s5 = scalar_lea.vmem %s3209_s22, 4096  ;;  %p2722_p1 = scmp.lt.s32.totalorder %s3209_s22, %s2720_s7 }
  0x4e   : > { %p2716_p12 = scmp.ne.s32.totalorder %s3209_s22, %s2715_s5  ;;  %p2723_p2 = scmp.lt.s32.totalorder %s2721_s8, %s2715_s5 }
  0x4f   : > { %978 = vmatmul.mubr.bf16.vlgmr.msra.gmra.mrb[0].mxu0 %v2619_v19  ;;  %1106 = vmatmul.mubr.bf16.vlgmr.msra.gmra.mrb[0].mxu1 %v2622_v20  ;;  %v3037_v19 = vld [vmem:[%s3264_s3] ss:$0 sm:$0xff] }
  0x50   : > { %985 = vmatprep.mubr.bf16.mxu0 %v2625_v21  ;;  %1113 = vmatprep.mubr.bf16.mxu1 %v2627_v22  ;;  %p2717_p13 = pnand %p2716_p12, %p2864_p4  ;;  %p2724_p3 = por %p2723_p2, %p2722_p1 }
  0x52   : > { %p2718_p0 = pneg %p2717_p13 }
  0x54   : > { %p2725_p5 = pnand %p2724_p3, %p2718_p0 }
  0x57   : > { %986 = vmatmul.mubr.bf16.gmra.mrb[4].mxu0 %v2629_v23  ;;  %1114 = vmatmul.mubr.bf16.gmra.mrb[4].mxu1 %v2630_v24 }
  0x58   : > { %993 = vmatprep.mubr.bf16.mxu0 %v2631_v25  ;;  %1121 = vmatprep.mubr.bf16.mxu1 %v2633_v26 }
  0x5f   : > { %994 = vmatmul.mubr.bf16.gmra.mrb[8].mxu0 %v2635_v27  ;;  %1122 = vmatmul.mubr.bf16.gmra.mrb[8].mxu1 %v2636_v28 }
  0x60   : > { %1001 = vmatprep.mubr.bf16.mxu0 %v2637_v29  ;;  %1129 = vmatprep.mubr.bf16.mxu1 %v2639_v30 }
  0x67   : > { %1002 = vmatmul.mubr.bf16.gmra.mrb[12].mxu0 %v2641_v31  ;;  %1130 = vmatmul.mubr.bf16.gmra.mrb[12].mxu1 %v2642_v32 }
  0x68   : > { %1009 = vmatprep.mubr.bf16.mxu0 %v2643_v33  ;;  %1137 = vmatprep.mubr.bf16.mxu1 %v2645_v34 }
  0x6f   : > { %1010 = vmatmul.mubr.bf16.gmra.mrb[16].mxu0 %v2647_v35  ;;  %1138 = vmatmul.mubr.bf16.gmra.mrb[16].mxu1 %v2648_v36 }
  0x70   : > { %1017 = vmatprep.mubr.bf16.mxu0 %v2649_v37  ;;  %1145 = vmatprep.mubr.bf16.mxu1 %v2651_v38 }
  0x77   : > { %1018 = vmatmul.mubr.bf16.gmra.mrb[20].mxu0 %v2653_v39  ;;  %1146 = vmatmul.mubr.bf16.gmra.mrb[20].mxu1 %v2654_v40 }
  0x78   : > { %1025 = vmatprep.mubr.bf16.mxu0 %v2655_v41  ;;  %1153 = vmatprep.mubr.bf16.mxu1 %v2657_v42 }
  0x7f   : > { %1026 = vmatmul.mubr.bf16.gmra.mrb[24].mxu0 %v2659_v43  ;;  %1154 = vmatmul.mubr.bf16.gmra.mrb[24].mxu1 %v2660_v44 }
  0x80   : > { %1033 = vmatprep.mubr.bf16.mxu0 %v2661_v45  ;;  %1161 = vmatprep.mubr.bf16.mxu1 %v2663_v46 }
  0x87   : > { %1034 = vmatmul.mubr.bf16.gmra.mrb[28].mxu0 %v2665_v47  ;;  %1162 = vmatmul.mubr.bf16.gmra.mrb[28].mxu1 %v2666_v48 }
  0x88   : > { %1041 = vmatprep.mubr.bf16.mxu0 %v2667_v49  ;;  %1169 = vmatprep.mubr.bf16.mxu1 %v2669_v50 }
  0x8f   : > { %1042 = vmatmul.mubr.bf16.gmra.mrb[32].mxu0 %v2671_v51  ;;  %1170 = vmatmul.mubr.bf16.gmra.mrb[32].mxu1 %v2672_v52 }
  0x90   : > { %1049 = vmatprep.mubr.bf16.mxu0 %v2673_v53  ;;  %1177 = vmatprep.mubr.bf16.mxu1 %v2675_v54 }
  0x97   : > { %1050 = vmatmul.mubr.bf16.gmra.mrb[36].mxu0 %v2677_v55  ;;  %1178 = vmatmul.mubr.bf16.gmra.mrb[36].mxu1 %v2678_v56 }
  0x98   : > { %1057 = vmatprep.mubr.bf16.mxu0 %v2679_v57  ;;  %1185 = vmatprep.mubr.bf16.mxu1 %v2681_v58 }
  0x9f   : > { %1058 = vmatmul.mubr.bf16.gmra.mrb[40].mxu0 %v2683_v59  ;;  %1186 = vmatmul.mubr.bf16.gmra.mrb[40].mxu1 %v2684_v60 }
  0xa0   : > { %1065 = vmatprep.mubr.bf16.mxu0 %v2685_v61  ;;  %1193 = vmatprep.mubr.bf16.mxu1 %v2687_v62 }
  0xa7   : > { %1066 = vmatmul.mubr.bf16.gmra.mrb[44].mxu0 %v2689_v63  ;;  %1194 = vmatmul.mubr.bf16.gmra.mrb[44].mxu1 %v2690_v0 }
  0xa8   : > { %1073 = vmatprep.mubr.bf16.mxu0 %v2691_v1  ;;  %1201 = vmatprep.mubr.bf16.mxu1 %v2693_v2 }
  0xaf   : > { %1074 = vmatmul.mubr.bf16.gmra.mrb[48].mxu0 %v2695_v3  ;;  %1202 = vmatmul.mubr.bf16.gmra.mrb[48].mxu1 %v2696_v4 }
  0xb0   : > { %1081 = vmatprep.mubr.bf16.mxu0 %v2697_v5  ;;  %1209 = vmatprep.mubr.bf16.mxu1 %v2699_v6 }
  0xb7   : > { %1082 = vmatmul.mubr.bf16.gmra.mrb[52].mxu0 %v2701_v7  ;;  %1210 = vmatmul.mubr.bf16.gmra.mrb[52].mxu1 %v2702_v8 }
  0xb8   : > { %1089 = vmatprep.mubr.bf16.mxu0 %v2703_v9  ;;  %1217 = vmatprep.mubr.bf16.mxu1 %v2705_v10 }
  0xbf   : > { %1090 = vmatmul.mubr.bf16.gmra.mrb[56].mxu0 %v2707_v11  ;;  %1218 = vmatmul.mubr.bf16.gmra.mrb[56].mxu1 %v2708_v12 }
  0xc0   : > { %1097 = vmatprep.mubr.bf16.mxu0 %v2709_v13  ;;  %1225 = vmatprep.mubr.bf16.mxu1 %v2711_v14 }
  0xc7   : > { %1098 = vmatmul.mubr.bf16.gmra.mrb[60].mxu0 %v2713_v15  ;;  %1226 = vmatmul.mubr.bf16.gmra.mrb[60].mxu1 %v2714_v16 }
 0x122   : > { %v979_v18 = vpop.f32.mrb[0].mxu0  ;;  %v1107_v20 = vpop.f32.mrb[0].mxu1 }
 0x123   : > { %v1436_v21 = vmul.f32 %v3032_v17, %v979_v18  ;;  %v1468_v22 = vmul.f32 %v3032_v17, %v1107_v20  ;;  %v981_v23 = vpop.f32.mrb[1].mxu0  ;;  %v1109_v24 = vpop.f32.mrb[1].mxu1 }
 0x124   : > { %v982_v25 = vpop.f32.mrb[2].mxu0  ;;  %v1110_v26 = vpop.f32.mrb[2].mxu1 }
 0x125   : > { %v1507_v27 = vadd.f32 %v3037_v19, %v1436_v21  ;;  %v1539_v28 = vadd.f32 %v3037_v19, %v1468_v22  ;;  %v1437_v29 = vmul.f32 %v3032_v17, %v982_v25  ;;  %v1469_v30 = vmul.f32 %v3032_v17, %v1110_v26  ;;  %v984_v31 = vpop.f32.mrb[3].mxu0  ;;  %v1112_v32 = vpop.f32.mrb[3].mxu1 }
 0x127   : > { %v1508_v33 = vadd.f32 %v3037_v19, %v1437_v29  ;;  %v1540_v34 = vadd.f32 %v3037_v19, %v1469_v30  ;;  %v1571_v35 = vmax.f32 %v1507_v27, 0.0  ;;  %v1603_v36 = vmax.f32 %v1539_v28, 0.0 }
 0x129   : > { %v1572_v37 = vmax.f32 %v1508_v33, 0.0  ;;  %v1604_v38 = vmax.f32 %v1540_v34, 0.0 }
 0x12a   : > { %v987_v39 = vpop.f32.mrb[4].mxu0  ;;  %v1115_v40 = vpop.f32.mrb[4].mxu1 }
 0x12b   : > { %v2325_v41 = vpack.c.bf16 %v1572_v37, %v1571_v35  ;;  %v2405_v42 = vpack.c.bf16 %v1604_v38, %v1603_v36  ;;  %v1438_v43 = vmul.f32 %v3032_v17, %v987_v39  ;;  %v1470_v44 = vmul.f32 %v3032_v17, %v1115_v40  ;;  %v989_v45 = vpop.f32.mrb[5].mxu0  ;;  %v1117_v46 = vpop.f32.mrb[5].mxu1 }
 0x12c   : > { %v990_v47 = vpop.f32.mrb[6].mxu0  ;;  %v1118_v48 = vpop.f32.mrb[6].mxu1 }
 0x12d   : > { %2326 = vst [vmem:[%s3052_s14] sm:$0xff] %v2325_v41   ;;  %2497 = vst [vmem:[%s3052_s14 + $0x80] sm:$0xff] %v2405_v42   ;;  %v1509_v49 = vadd.f32 %v3037_v19, %v1438_v43  ;;  %v1541_v50 = vadd.f32 %v3037_v19, %v1470_v44  ;;  %v1439_v51 = vmul.f32 %v3032_v17, %v990_v47  ;;  %v992_v53 = vpop.f32.mrb[7].mxu0  ;;  %v1120_v54 = vpop.f32.mrb[7].mxu1 }
 0x12e   : > { %v1471_v52 = vmul.f32 %v3032_v17, %v1118_v48 }
 0x12f   : > { %v1510_v55 = vadd.f32 %v3037_v19, %v1439_v51  ;;  %v1573_v57 = vmax.f32 %v1509_v49, 0.0  ;;  %v1605_v58 = vmax.f32 %v1541_v50, 0.0 }
 0x130   : > { %v1542_v56 = vadd.f32 %v3037_v19, %v1471_v52 }
 0x131   : > { %v1574_v59 = vmax.f32 %v1510_v55, 0.0 }
 0x132   : > { %v1606_v60 = vmax.f32 %v1542_v56, 0.0  ;;  %v995_v61 = vpop.f32.mrb[8].mxu0  ;;  %v1123_v62 = vpop.f32.mrb[8].mxu1 }
 0x133   : > { %v2330_v63 = vpack.c.bf16 %v1574_v59, %v1573_v57  ;;  %v1440_v1 = vmul.f32 %v3032_v17, %v995_v61  ;;  %v1472_v2 = vmul.f32 %v3032_v17, %v1123_v62  ;;  %v997_v3 = vpop.f32.mrb[9].mxu0  ;;  %v1125_v4 = vpop.f32.mrb[9].mxu1 }
 0x134   : > { %v2410_v0 = vpack.c.bf16 %v1606_v60, %v1605_v58  ;;  %v998_v5 = vpop.f32.mrb[10].mxu0  ;;  %v1126_v6 = vpop.f32.mrb[10].mxu1 }
 0x135   : > { %2482 = vst [vmem:[%s3052_s14 + $0x8] sm:$0xff] %v2330_v63   ;;  %v1511_v7 = vadd.f32 %v3037_v19, %v1440_v1  ;;  %v1543_v8 = vadd.f32 %v3037_v19, %v1472_v2  ;;  %v1441_v9 = vmul.f32 %v3032_v17, %v998_v5  ;;  %v1473_v10 = vmul.f32 %v3032_v17, %v1126_v6  ;;  %v1000_v11 = vpop.f32.mrb[11].mxu0  ;;  %v1128_v12 = vpop.f32.mrb[11].mxu1 }
 0x136   : > { %2498 = vst [vmem:[%s3052_s14 + $0x88] sm:$0xff] %v2410_v0  }
 0x137   : > { %v1512_v13 = vadd.f32 %v3037_v19, %v1441_v9  ;;  %v1544_v14 = vadd.f32 %v3037_v19, %v1473_v10  ;;  %v1575_v15 = vmax.f32 %v1511_v7, 0.0  ;;  %v1607_v16 = vmax.f32 %v1543_v8, 0.0 }
 0x139   : > { %v1576_v18 = vmax.f32 %v1512_v13, 0.0  ;;  %v1608_v20 = vmax.f32 %v1544_v14, 0.0 }
 0x13a   : > { %v1003_v21 = vpop.f32.mrb[12].mxu0  ;;  %v1131_v22 = vpop.f32.mrb[12].mxu1 }
 0x13b   : > { %v2335_v23 = vpack.c.bf16 %v1576_v18, %v1575_v15  ;;  %v2415_v24 = vpack.c.bf16 %v1608_v20, %v1607_v16  ;;  %v1442_v25 = vmul.f32 %v3032_v17, %v1003_v21  ;;  %v1474_v26 = vmul.f32 %v3032_v17, %v1131_v22  ;;  %v1005_v27 = vpop.f32.mrb[13].mxu0  ;;  %v1133_v28 = vpop.f32.mrb[13].mxu1 }
 0x13c   : > { %v1006_v29 = vpop.f32.mrb[14].mxu0  ;;  %v1134_v30 = vpop.f32.mrb[14].mxu1 }
 0x13d   : > { %2483 = vst [vmem:[%s3052_s14 + $0x10] sm:$0xff] %v2335_v23   ;;  %2499 = vst [vmem:[%s3052_s14 + $0x90] sm:$0xff] %v2415_v24   ;;  %v1513_v31 = vadd.f32 %v3037_v19, %v1442_v25  ;;  %v1545_v32 = vadd.f32 %v3037_v19, %v1474_v26  ;;  %v1443_v33 = vmul.f32 %v3032_v17, %v1006_v29  ;;  %v1008_v35 = vpop.f32.mrb[15].mxu0  ;;  %v1136_v36 = vpop.f32.mrb[15].mxu1 }
 0x13e   : > { %v1475_v34 = vmul.f32 %v3032_v17, %v1134_v30 }
 0x13f   : > { %v1514_v37 = vadd.f32 %v3037_v19, %v1443_v33  ;;  %v1577_v39 = vmax.f32 %v1513_v31, 0.0  ;;  %v1609_v40 = vmax.f32 %v1545_v32, 0.0 }
 0x140   : > { %v1546_v38 = vadd.f32 %v3037_v19, %v1475_v34 }
 0x141   : > { %v1578_v41 = vmax.f32 %v1514_v37, 0.0 }
 0x142   : > { %v1610_v42 = vmax.f32 %v1546_v38, 0.0  ;;  %v1011_v43 = vpop.f32.mrb[16].mxu0  ;;  %v1139_v44 = vpop.f32.mrb[16].mxu1 }
 0x143   : > { %v2340_v45 = vpack.c.bf16 %v1578_v41, %v1577_v39  ;;  %v1444_v47 = vmul.f32 %v3032_v17, %v1011_v43  ;;  %v1476_v48 = vmul.f32 %v3032_v17, %v1139_v44  ;;  %v1013_v49 = vpop.f32.mrb[17].mxu0  ;;  %v1141_v50 = vpop.f32.mrb[17].mxu1 }
 0x144   : > { %v2420_v46 = vpack.c.bf16 %v1610_v42, %v1609_v40  ;;  %v1014_v51 = vpop.f32.mrb[18].mxu0  ;;  %v1142_v52 = vpop.f32.mrb[18].mxu1 }
 0x145   : > { %2484 = vst [vmem:[%s3052_s14 + $0x18] sm:$0xff] %v2340_v45   ;;  %v1515_v53 = vadd.f32 %v3037_v19, %v1444_v47  ;;  %v1547_v54 = vadd.f32 %v3037_v19, %v1476_v48  ;;  %v1445_v55 = vmul.f32 %v3032_v17, %v1014_v51  ;;  %v1477_v56 = vmul.f32 %v3032_v17, %v1142_v52  ;;  %v1016_v57 = vpop.f32.mrb[19].mxu0  ;;  %v1144_v58 = vpop.f32.mrb[19].mxu1 }
 0x146   : > { %2500 = vst [vmem:[%s3052_s14 + $0x98] sm:$0xff] %v2420_v46  }
 0x147   : > { %v1516_v59 = vadd.f32 %v3037_v19, %v1445_v55  ;;  %v1548_v60 = vadd.f32 %v3037_v19, %v1477_v56  ;;  %v1579_v61 = vmax.f32 %v1515_v53, 0.0  ;;  %v1611_v62 = vmax.f32 %v1547_v54, 0.0 }
 0x149   : > { %v1580_v63 = vmax.f32 %v1516_v59, 0.0  ;;  %v1612_v0 = vmax.f32 %v1548_v60, 0.0 }
 0x14a   : > { %v1019_v1 = vpop.f32.mrb[20].mxu0  ;;  %v1147_v2 = vpop.f32.mrb[20].mxu1 }
 0x14b   : > { %v2345_v3 = vpack.c.bf16 %v1580_v63, %v1579_v61  ;;  %v2425_v4 = vpack.c.bf16 %v1612_v0, %v1611_v62  ;;  %v1446_v5 = vmul.f32 %v3032_v17, %v1019_v1  ;;  %v1478_v6 = vmul.f32 %v3032_v17, %v1147_v2  ;;  %v1021_v7 = vpop.f32.mrb[21].mxu0  ;;  %v1149_v8 = vpop.f32.mrb[21].mxu1 }
 0x14c   : > { %v1022_v9 = vpop.f32.mrb[22].mxu0  ;;  %v1150_v10 = vpop.f32.mrb[22].mxu1 }
 0x14d   : > { %2485 = vst [vmem:[%s3052_s14 + $0x20] sm:$0xff] %v2345_v3   ;;  %2501 = vst [vmem:[%s3052_s14 + $0xa0] sm:$0xff] %v2425_v4   ;;  %v1517_v11 = vadd.f32 %v3037_v19, %v1446_v5  ;;  %v1549_v12 = vadd.f32 %v3037_v19, %v1478_v6  ;;  %v1447_v13 = vmul.f32 %v3032_v17, %v1022_v9  ;;  %v1024_v15 = vpop.f32.mrb[23].mxu0  ;;  %v1152_v16 = vpop.f32.mrb[23].mxu1 }
 0x14e   : > { %v1479_v14 = vmul.f32 %v3032_v17, %v1150_v10 }
 0x14f   : > { %v1518_v18 = vadd.f32 %v3037_v19, %v1447_v13  ;;  %v1581_v21 = vmax.f32 %v1517_v11, 0.0  ;;  %v1613_v22 = vmax.f32 %v1549_v12, 0.0 }
 0x150   : > { %v1550_v20 = vadd.f32 %v3037_v19, %v1479_v14 }
 0x151   : > { %v1582_v23 = vmax.f32 %v1518_v18, 0.0 }
 0x152   : > { %v1614_v24 = vmax.f32 %v1550_v20, 0.0  ;;  %v1027_v25 = vpop.f32.mrb[24].mxu0  ;;  %v1155_v26 = vpop.f32.mrb[24].mxu1 }
 0x153   : > { %v2350_v27 = vpack.c.bf16 %v1582_v23, %v1581_v21  ;;  %v1448_v29 = vmul.f32 %v3032_v17, %v1027_v25  ;;  %v1480_v30 = vmul.f32 %v3032_v17, %v1155_v26  ;;  %v1029_v31 = vpop.f32.mrb[25].mxu0  ;;  %v1157_v32 = vpop.f32.mrb[25].mxu1 }
 0x154   : > { %v2430_v28 = vpack.c.bf16 %v1614_v24, %v1613_v22  ;;  %v1030_v33 = vpop.f32.mrb[26].mxu0  ;;  %v1158_v34 = vpop.f32.mrb[26].mxu1 }
 0x155   : > { %2486 = vst [vmem:[%s3052_s14 + $0x28] sm:$0xff] %v2350_v27   ;;  %v1519_v35 = vadd.f32 %v3037_v19, %v1448_v29  ;;  %v1551_v36 = vadd.f32 %v3037_v19, %v1480_v30  ;;  %v1449_v37 = vmul.f32 %v3032_v17, %v1030_v33  ;;  %v1481_v38 = vmul.f32 %v3032_v17, %v1158_v34  ;;  %v1032_v39 = vpop.f32.mrb[27].mxu0  ;;  %v1160_v40 = vpop.f32.mrb[27].mxu1 }
 0x156   : > { %2502 = vst [vmem:[%s3052_s14 + $0xa8] sm:$0xff] %v2430_v28  }
 0x157   : > { %v1520_v41 = vadd.f32 %v3037_v19, %v1449_v37  ;;  %v1552_v42 = vadd.f32 %v3037_v19, %v1481_v38  ;;  %v1583_v43 = vmax.f32 %v1519_v35, 0.0  ;;  %v1615_v44 = vmax.f32 %v1551_v36, 0.0 }
 0x159   : > { %v1584_v45 = vmax.f32 %v1520_v41, 0.0  ;;  %v1616_v46 = vmax.f32 %v1552_v42, 0.0 }
 0x15a   : > { %v1035_v47 = vpop.f32.mrb[28].mxu0  ;;  %v1163_v48 = vpop.f32.mrb[28].mxu1 }
 0x15b   : > { %v2355_v49 = vpack.c.bf16 %v1584_v45, %v1583_v43  ;;  %v2435_v50 = vpack.c.bf16 %v1616_v46, %v1615_v44  ;;  %v1450_v51 = vmul.f32 %v3032_v17, %v1035_v47  ;;  %v1482_v52 = vmul.f32 %v3032_v17, %v1163_v48  ;;  %v1037_v53 = vpop.f32.mrb[29].mxu0  ;;  %v1165_v54 = vpop.f32.mrb[29].mxu1 }
 0x15c   : > { %v1038_v55 = vpop.f32.mrb[30].mxu0  ;;  %v1166_v56 = vpop.f32.mrb[30].mxu1 }
 0x15d   : > { %2487 = vst [vmem:[%s3052_s14 + $0x30] sm:$0xff] %v2355_v49   ;;  %2503 = vst [vmem:[%s3052_s14 + $0xb0] sm:$0xff] %v2435_v50   ;;  %v1521_v57 = vadd.f32 %v3037_v19, %v1450_v51  ;;  %v1553_v58 = vadd.f32 %v3037_v19, %v1482_v52  ;;  %v1451_v59 = vmul.f32 %v3032_v17, %v1038_v55  ;;  %v1040_v61 = vpop.f32.mrb[31].mxu0  ;;  %v1168_v62 = vpop.f32.mrb[31].mxu1 }
 0x15e   : > { %v1483_v60 = vmul.f32 %v3032_v17, %v1166_v56 }
 0x15f   : > { %v1522_v63 = vadd.f32 %v3037_v19, %v1451_v59  ;;  %v1585_v1 = vmax.f32 %v1521_v57, 0.0  ;;  %v1617_v2 = vmax.f32 %v1553_v58, 0.0 }
 0x160   : > { %v1554_v0 = vadd.f32 %v3037_v19, %v1483_v60 }
 0x161   : > { %v1586_v3 = vmax.f32 %v1522_v63, 0.0 }
 0x162   : > { %v1618_v4 = vmax.f32 %v1554_v0, 0.0  ;;  %v1043_v5 = vpop.f32.mrb[32].mxu0  ;;  %v1171_v6 = vpop.f32.mrb[32].mxu1 }
 0x163   : > { %v2360_v7 = vpack.c.bf16 %v1586_v3, %v1585_v1  ;;  %v1452_v9 = vmul.f32 %v3032_v17, %v1043_v5  ;;  %v1484_v10 = vmul.f32 %v3032_v17, %v1171_v6  ;;  %v1045_v11 = vpop.f32.mrb[33].mxu0  ;;  %v1173_v12 = vpop.f32.mrb[33].mxu1 }
 0x164   : > { %v2440_v8 = vpack.c.bf16 %v1618_v4, %v1617_v2  ;;  %v1046_v13 = vpop.f32.mrb[34].mxu0  ;;  %v1174_v14 = vpop.f32.mrb[34].mxu1 }
 0x165   : > { %2488 = vst [vmem:[%s3052_s14 + $0x38] sm:$0xff] %v2360_v7   ;;  %v1523_v15 = vadd.f32 %v3037_v19, %v1452_v9  ;;  %v1555_v16 = vadd.f32 %v3037_v19, %v1484_v10  ;;  %v1453_v18 = vmul.f32 %v3032_v17, %v1046_v13  ;;  %v1485_v20 = vmul.f32 %v3032_v17, %v1174_v14  ;;  %v1048_v21 = vpop.f32.mrb[35].mxu0  ;;  %v1176_v22 = vpop.f32.mrb[35].mxu1 }
 0x166   : > { %2504 = vst [vmem:[%s3052_s14 + $0xb8] sm:$0xff] %v2440_v8  }
 0x167   : > { %v1524_v23 = vadd.f32 %v3037_v19, %v1453_v18  ;;  %v1556_v24 = vadd.f32 %v3037_v19, %v1485_v20  ;;  %v1587_v25 = vmax.f32 %v1523_v15, 0.0  ;;  %v1619_v26 = vmax.f32 %v1555_v16, 0.0 }
 0x169   : > { %v1588_v27 = vmax.f32 %v1524_v23, 0.0  ;;  %v1620_v28 = vmax.f32 %v1556_v24, 0.0 }
 0x16a   : > { %v1051_v29 = vpop.f32.mrb[36].mxu0  ;;  %v1179_v30 = vpop.f32.mrb[36].mxu1 }
 0x16b   : > { %v2365_v31 = vpack.c.bf16 %v1588_v27, %v1587_v25  ;;  %v2445_v32 = vpack.c.bf16 %v1620_v28, %v1619_v26  ;;  %v1454_v33 = vmul.f32 %v3032_v17, %v1051_v29  ;;  %v1486_v34 = vmul.f32 %v3032_v17, %v1179_v30  ;;  %v1053_v35 = vpop.f32.mrb[37].mxu0  ;;  %v1181_v36 = vpop.f32.mrb[37].mxu1 }
 0x16c   : > { %v1054_v37 = vpop.f32.mrb[38].mxu0  ;;  %v1182_v38 = vpop.f32.mrb[38].mxu1 }
 0x16d   : > { %2489 = vst [vmem:[%s3052_s14 + $0x40] sm:$0xff] %v2365_v31   ;;  %2505 = vst [vmem:[%s3052_s14 + $0xc0] sm:$0xff] %v2445_v32   ;;  %v1525_v39 = vadd.f32 %v3037_v19, %v1454_v33  ;;  %v1557_v40 = vadd.f32 %v3037_v19, %v1486_v34  ;;  %v1455_v41 = vmul.f32 %v3032_v17, %v1054_v37  ;;  %v1056_v43 = vpop.f32.mrb[39].mxu0  ;;  %v1184_v44 = vpop.f32.mrb[39].mxu1 }
 0x16e   : > { %v1487_v42 = vmul.f32 %v3032_v17, %v1182_v38 }
 0x16f   : > { %v1526_v45 = vadd.f32 %v3037_v19, %v1455_v41  ;;  %v1589_v47 = vmax.f32 %v1525_v39, 0.0  ;;  %v1621_v48 = vmax.f32 %v1557_v40, 0.0 }
 0x170   : > { %v1558_v46 = vadd.f32 %v3037_v19, %v1487_v42 }
 0x171   : > { %v1590_v49 = vmax.f32 %v1526_v45, 0.0 }
 0x172   : > { %v1622_v50 = vmax.f32 %v1558_v46, 0.0  ;;  %v1059_v51 = vpop.f32.mrb[40].mxu0  ;;  %v1187_v52 = vpop.f32.mrb[40].mxu1 }
 0x173   : > { %v2370_v53 = vpack.c.bf16 %v1590_v49, %v1589_v47  ;;  %v1456_v55 = vmul.f32 %v3032_v17, %v1059_v51  ;;  %v1488_v56 = vmul.f32 %v3032_v17, %v1187_v52  ;;  %v1061_v57 = vpop.f32.mrb[41].mxu0  ;;  %v1189_v58 = vpop.f32.mrb[41].mxu1 }
 0x174   : > { %v2450_v54 = vpack.c.bf16 %v1622_v50, %v1621_v48  ;;  %v1062_v59 = vpop.f32.mrb[42].mxu0  ;;  %v1190_v60 = vpop.f32.mrb[42].mxu1 }
 0x175   : > { %2490 = vst [vmem:[%s3052_s14 + $0x48] sm:$0xff] %v2370_v53   ;;  %v1527_v61 = vadd.f32 %v3037_v19, %v1456_v55  ;;  %v1559_v62 = vadd.f32 %v3037_v19, %v1488_v56  ;;  %v1457_v63 = vmul.f32 %v3032_v17, %v1062_v59  ;;  %v1489_v0 = vmul.f32 %v3032_v17, %v1190_v60  ;;  %v1064_v1 = vpop.f32.mrb[43].mxu0  ;;  %v1192_v2 = vpop.f32.mrb[43].mxu1 }
 0x176   : > { %2506 = vst [vmem:[%s3052_s14 + $0xc8] sm:$0xff] %v2450_v54  }
 0x177   : > { %v1528_v3 = vadd.f32 %v3037_v19, %v1457_v63  ;;  %v1560_v4 = vadd.f32 %v3037_v19, %v1489_v0  ;;  %v1591_v5 = vmax.f32 %v1527_v61, 0.0  ;;  %v1623_v6 = vmax.f32 %v1559_v62, 0.0 }
 0x179   : > { %v1592_v7 = vmax.f32 %v1528_v3, 0.0  ;;  %v1624_v8 = vmax.f32 %v1560_v4, 0.0 }
 0x17a   : > { %v1067_v9 = vpop.f32.mrb[44].mxu0  ;;  %v1195_v10 = vpop.f32.mrb[44].mxu1 }
 0x17b   : > { %v2375_v11 = vpack.c.bf16 %v1592_v7, %v1591_v5  ;;  %v2455_v12 = vpack.c.bf16 %v1624_v8, %v1623_v6  ;;  %v1458_v13 = vmul.f32 %v3032_v17, %v1067_v9  ;;  %v1490_v14 = vmul.f32 %v3032_v17, %v1195_v10  ;;  %v1069_v15 = vpop.f32.mrb[45].mxu0  ;;  %v1197_v16 = vpop.f32.mrb[45].mxu1 }
 0x17c   : > { %v1070_v18 = vpop.f32.mrb[46].mxu0  ;;  %v1198_v20 = vpop.f32.mrb[46].mxu1 }
 0x17d   : > { %2491 = vst [vmem:[%s3052_s14 + $0x50] sm:$0xff] %v2375_v11   ;;  %2507 = vst [vmem:[%s3052_s14 + $0xd0] sm:$0xff] %v2455_v12   ;;  %v1529_v21 = vadd.f32 %v3037_v19, %v1458_v13  ;;  %v1561_v22 = vadd.f32 %v3037_v19, %v1490_v14  ;;  %v1459_v23 = vmul.f32 %v3032_v17, %v1070_v18  ;;  %v1072_v25 = vpop.f32.mrb[47].mxu0  ;;  %v1200_v26 = vpop.f32.mrb[47].mxu1 }
 0x17e   : > { %v1491_v24 = vmul.f32 %v3032_v17, %v1198_v20 }
 0x17f   : > { %v1530_v27 = vadd.f32 %v3037_v19, %v1459_v23  ;;  %v1593_v29 = vmax.f32 %v1529_v21, 0.0  ;;  %v1625_v30 = vmax.f32 %v1561_v22, 0.0 }
 0x180   : > { %v1562_v28 = vadd.f32 %v3037_v19, %v1491_v24 }
 0x181   : > { %v1594_v31 = vmax.f32 %v1530_v27, 0.0 }
 0x182   : > { %v1626_v32 = vmax.f32 %v1562_v28, 0.0  ;;  %v1075_v33 = vpop.f32.mrb[48].mxu0  ;;  %v1203_v34 = vpop.f32.mrb[48].mxu1 }
 0x183   : > { %v2380_v35 = vpack.c.bf16 %v1594_v31, %v1593_v29  ;;  %v1460_v37 = vmul.f32 %v3032_v17, %v1075_v33  ;;  %v1492_v38 = vmul.f32 %v3032_v17, %v1203_v34  ;;  %v1077_v39 = vpop.f32.mrb[49].mxu0  ;;  %v1205_v40 = vpop.f32.mrb[49].mxu1 }
 0x184   : > { %v2460_v36 = vpack.c.bf16 %v1626_v32, %v1625_v30  ;;  %v1078_v41 = vpop.f32.mrb[50].mxu0  ;;  %v1206_v42 = vpop.f32.mrb[50].mxu1 }
 0x185   : > { %2492 = vst [vmem:[%s3052_s14 + $0x58] sm:$0xff] %v2380_v35   ;;  %v1531_v43 = vadd.f32 %v3037_v19, %v1460_v37  ;;  %v1563_v44 = vadd.f32 %v3037_v19, %v1492_v38  ;;  %v1461_v45 = vmul.f32 %v3032_v17, %v1078_v41  ;;  %v1493_v46 = vmul.f32 %v3032_v17, %v1206_v42  ;;  %v1080_v47 = vpop.f32.mrb[51].mxu0  ;;  %v1208_v48 = vpop.f32.mrb[51].mxu1 }
 0x186   : > { %2508 = vst [vmem:[%s3052_s14 + $0xd8] sm:$0xff] %v2460_v36  }
 0x187   : > { %v1532_v49 = vadd.f32 %v3037_v19, %v1461_v45  ;;  %v1564_v50 = vadd.f32 %v3037_v19, %v1493_v46  ;;  %v1595_v51 = vmax.f32 %v1531_v43, 0.0  ;;  %v1627_v52 = vmax.f32 %v1563_v44, 0.0 }
 0x189   : > { %v1596_v53 = vmax.f32 %v1532_v49, 0.0  ;;  %v1628_v54 = vmax.f32 %v1564_v50, 0.0 }
 0x18a   : > { %v1083_v55 = vpop.f32.mrb[52].mxu0  ;;  %v1211_v56 = vpop.f32.mrb[52].mxu1 }
 0x18b   : > { %v2385_v57 = vpack.c.bf16 %v1596_v53, %v1595_v51  ;;  %v2465_v58 = vpack.c.bf16 %v1628_v54, %v1627_v52  ;;  %v1462_v59 = vmul.f32 %v3032_v17, %v1083_v55  ;;  %v1494_v60 = vmul.f32 %v3032_v17, %v1211_v56  ;;  %v1085_v61 = vpop.f32.mrb[53].mxu0  ;;  %v1213_v62 = vpop.f32.mrb[53].mxu1 }
 0x18c   : > { %v1086_v63 = vpop.f32.mrb[54].mxu0  ;;  %v1214_v0 = vpop.f32.mrb[54].mxu1 }
 0x18d   : > { %2493 = vst [vmem:[%s3052_s14 + $0x60] sm:$0xff] %v2385_v57   ;;  %2509 = vst [vmem:[%s3052_s14 + $0xe0] sm:$0xff] %v2465_v58   ;;  %v1533_v1 = vadd.f32 %v3037_v19, %v1462_v59  ;;  %v1565_v2 = vadd.f32 %v3037_v19, %v1494_v60  ;;  %v1463_v3 = vmul.f32 %v3032_v17, %v1086_v63  ;;  %v1088_v5 = vpop.f32.mrb[55].mxu0  ;;  %v1216_v6 = vpop.f32.mrb[55].mxu1 }
 0x18e   : > { %v1495_v4 = vmul.f32 %v3032_v17, %v1214_v0 }
 0x18f   : > { %v1534_v7 = vadd.f32 %v3037_v19, %v1463_v3  ;;  %v1597_v9 = vmax.f32 %v1533_v1, 0.0  ;;  %v1629_v10 = vmax.f32 %v1565_v2, 0.0 }
 0x190   : > { %v1566_v8 = vadd.f32 %v3037_v19, %v1495_v4 }
 0x191   : > { %v1598_v11 = vmax.f32 %v1534_v7, 0.0 }
 0x192   : > { %v1630_v12 = vmax.f32 %v1566_v8, 0.0  ;;  %v1091_v13 = vpop.f32.mrb[56].mxu0  ;;  %v1219_v14 = vpop.f32.mrb[56].mxu1 }
 0x193   : > { %v2390_v15 = vpack.c.bf16 %v1598_v11, %v1597_v9  ;;  %v1464_v18 = vmul.f32 %v3032_v17, %v1091_v13  ;;  %v1496_v20 = vmul.f32 %v3032_v17, %v1219_v14  ;;  %v1093_v21 = vpop.f32.mrb[57].mxu0  ;;  %v1221_v22 = vpop.f32.mrb[57].mxu1 }
 0x194   : > { %v2470_v16 = vpack.c.bf16 %v1630_v12, %v1629_v10  ;;  %v1094_v23 = vpop.f32.mrb[58].mxu0  ;;  %v1222_v24 = vpop.f32.mrb[58].mxu1 }
 0x195   : > { %2494 = vst [vmem:[%s3052_s14 + $0x68] sm:$0xff] %v2390_v15   ;;  %v1535_v25 = vadd.f32 %v3037_v19, %v1464_v18  ;;  %v1567_v26 = vadd.f32 %v3037_v19, %v1496_v20  ;;  %v1465_v27 = vmul.f32 %v3032_v17, %v1094_v23  ;;  %v1497_v28 = vmul.f32 %v3032_v17, %v1222_v24  ;;  %v1096_v29 = vpop.f32.mrb[59].mxu0  ;;  %v1224_v30 = vpop.f32.mrb[59].mxu1 }
 0x196   : > { %2510 = vst [vmem:[%s3052_s14 + $0xe8] sm:$0xff] %v2470_v16  }
 0x197   : > { %v1536_v31 = vadd.f32 %v3037_v19, %v1465_v27  ;;  %v1568_v32 = vadd.f32 %v3037_v19, %v1497_v28  ;;  %v1599_v33 = vmax.f32 %v1535_v25, 0.0  ;;  %v1631_v34 = vmax.f32 %v1567_v26, 0.0 }
 0x199   : > { %v1600_v35 = vmax.f32 %v1536_v31, 0.0  ;;  %v1632_v36 = vmax.f32 %v1568_v32, 0.0 }
 0x19a   : > { %v1099_v37 = vpop.f32.mrb[60].mxu0  ;;  %v1227_v38 = vpop.f32.mrb[60].mxu1 }
 0x19b   : > { %v2395_v39 = vpack.c.bf16 %v1600_v35, %v1599_v33  ;;  %v2475_v40 = vpack.c.bf16 %v1632_v36, %v1631_v34  ;;  %v1466_v41 = vmul.f32 %v3032_v17, %v1099_v37  ;;  %v1498_v42 = vmul.f32 %v3032_v17, %v1227_v38  ;;  %v1101_v43 = vpop.f32.mrb[61].mxu0  ;;  %v1229_v44 = vpop.f32.mrb[61].mxu1 }
 0x19c   : > { %v1102_v45 = vpop.f32.mrb[62].mxu0  ;;  %v1230_v46 = vpop.f32.mrb[62].mxu1 }
 0x19d   : > { %2495 = vst [vmem:[%s3052_s14 + $0x70] sm:$0xff] %v2395_v39   ;;  %2511 = vst [vmem:[%s3052_s14 + $0xf0] sm:$0xff] %v2475_v40   ;;  %v1537_v47 = vadd.f32 %v3037_v19, %v1466_v41  ;;  %v1569_v48 = vadd.f32 %v3037_v19, %v1498_v42  ;;  %v1467_v49 = vmul.f32 %v3032_v17, %v1102_v45  ;;  %v1104_v51 = vpop.f32.mrb[63].mxu0  ;;  %v1232_v52 = vpop.f32.mrb[63].mxu1 }
 0x19e   : > { %v1499_v50 = vmul.f32 %v3032_v17, %v1230_v46 }
 0x19f   : > { %v1538_v53 = vadd.f32 %v3037_v19, %v1467_v49  ;;  %v1601_v55 = vmax.f32 %v1537_v47, 0.0  ;;  %v1633_v56 = vmax.f32 %v1569_v48, 0.0 }
 0x1a0   : > { %v1570_v54 = vadd.f32 %v3037_v19, %v1499_v50 }
 0x1a1   : > { %v1602_v57 = vmax.f32 %v1538_v53, 0.0 }
 0x1a2   : > { %v1634_v58 = vmax.f32 %v1570_v54, 0.0 }
 0x1a3   : > { %v2400_v17 = vpack.c.bf16 %v1602_v57, %v1601_v55 }
 0x1a4   : > { %v2480_v59 = vpack.c.bf16 %v1634_v58, %v1633_v56 }
 0x1a5   : > { %2496 = vst [vmem:[%s3052_s14 + $0x78] sm:$0xff] %v2400_v17  }
 0x1a6   : > { %2512 = vst [vmem:[%s3052_s14 + $0xf8] sm:$0xff] %v2480_v59  }
 0x1a7   : > { %2728 = shalt.err (!%p2725_p5)
}
 0x1a8   : > { %s2729_s9 = scalar_lea.hbm %s3207_s30, 4096  ;;  %s2733_s12 = scalar_lea.hbm %s3265_s4, 16384 }
 0x1a9   : > { %p2730_p6 = scmp.ne.s32.totalorder %s3207_s30, %s2729_s9  ;;  %p2734_p10 = scmp.lt.u32.totalorder %s3207_s30, %s3265_s4 }
 0x1aa   : > { %p2735_p11 = scmp.lt.u32.totalorder %s2733_s12, %s2729_s9  ;;  %p2737_p13 = scmp.lt.u32.totalorder %s2729_s9, %s3207_s30 }
 0x1ab   : > { %p2731_p7 = pnand %p2730_p6, %p2864_p4 }
 0x1ac   : > { %p2736_p12 = por %p2735_p11, %p2734_p10 }
 0x1ad   : > { %p2732_p9 = pneg %p2731_p7 }
 0x1ae   : > { %p2738_p0 = por %p2737_p13, %p2736_p12 }
 0x1b0   : > { %p2739_p1 = pnand %p2738_p0, %p2732_p9 }
 0x1b2   : > { %2742 = shalt.err (!%p2739_p1)
}
 0x1b3   : > { %s2797_s14 = smov 64   ;;  %s2798_s21 = smov 4  }
 0x1b4   : > { %2545 = dma.vmem_to_hbm [thread:$0]  (%p2864_p4), %s3209_s22, 4096, %s3207_s30, %s3215_s18, %s2797_s14, %s2797_s14, %s2798_s21  }
 0x1b5 PF: > { %p2551_p2 = scmp.ge.s32.totalorder %s2793_s20, 2  ;;  %s1985_s26 = sand.u32 1, %s2773_s15  }
 0x1b6   : > { %s1986_s29 = scalar_lea.sflag [#allocation4], %s1985_s26 }
 0x1b7   : > { %p2548_p3 = pnand %p2551_p2, %p2871_p8 }
 0x1b9   : > { %2768 = dma.done.wait (!%p2548_p3), %s1986_s29, 4096  }
 0x1ba   : > { %2770 = vsyncadd (!%p2548_p3), %s1986_s29, 4294963200  ;;  %s17_s20 = sadd.s32 1, %s2793_s20   ;;  %s3268_s15 = smov %s2777_s16 }
 0x1bb   : > { %p14_p5 = scmp.ge.s32.totalorder %s17_s20, 6   ;;  %s3269_s16 = smov %s2781_s17 }
 0x1bc   : > { %s3270_s17 = smov %s2877_s28  ;;  %s3271_s18 = smov %s2789_s19 }
 0x1bd   : > { %s3272_s19 = smov %s3274_s23  ;;  %16 = sbr.rel (!%p14_p5) target bundleno = 4 (0x4), region = 88 }
 0x1c4   :  { %1991 = vsyncpa [#allocation4], 1 }
 0x1c5   :  { %1993 = vsyncpa [#allocation4 + $0x1], 1 }

</bundles_post_ra>
